<compile_context>
chip_gen: v7x
topology: tpu7x:2x2x1
jax: 0.10.0
libtpu: 0.0.40
codegen_flags: <defaults>
</compile_context>

<pallas_src>
import functools

import jax
import jax.numpy as jnp
from jax.experimental import pallas as pl
from jax.experimental.pallas import tpu as pltpu

LANE = 128
SUBLANE = 8

# Per-chip config: (num_parts, bytes per input per buffer, vmem_limit_bytes)
_CHIP_CONFIG = {
    "v5e": (1, 2 << 20, None),        # ~16 MiB scoped default; keep buffers <= 8 MiB
    "v6e": (1, 4 << 20, 64 << 20),    # 1 TC; 16 MiB buffers, raise scoped limit
    "v7x": (2, 4 << 20, 32 << 20),    # 2 TCs, 64 MiB physical VMEM per TC
    "unknown": (1, 2 << 20, None),    # conservative
}


def _cdiv(a, b):
    return -(-a // b)


def _round_up(a, b):
    return _cdiv(a, b) * b


def _detect_chip():
    try:
        kind = jax.devices()[0].device_kind.lower()
    except Exception:
        return "unknown"
    if "v5e" in kind or "v5 lite" in kind or "v5litepod" in kind:
        return "v5e"
    if "v6" in kind:
        return "v6e"
    if "7" in kind:
        return "v7x"
    return "unknown"


def _od_loss_kernel(p_ref, t_ref, out_ref, *, rows, num_blocks):
    part = pl.program_id(0)
    step = pl.program_id(1)
    steps_per_part = pl.num_programs(1)

    # Output block (1, 8, 128) is the per-part accumulator; zero it at the
    # start of each part's reduction sweep.
    @pl.when(step == 0)
    def _():
        out_ref[...] = jnp.zeros_like(out_ref)

    p = p_ref[...].astype(jnp.float32)
    t = t_ref[...].astype(jnp.float32)

    # Fused form of the two-branch loss:
    #   truth >= 1 : (p - t)^2
    #   truth <  1 : (relu(p) - t)^2
    p_eff = jnp.where(t < 1.0, jnp.maximum(p, 0.0), p)
    d = p_eff - t
    term = d * d

    blk_idx = part * steps_per_part + step
    blk_rows = term.shape[0]

    def _accumulate(x):
        # (blk_rows, 128) -> (blk_rows//8, 8, 128) is a free relabel; the sum
        # over axis 0 is plain vreg-wise VPU adds into the resident out block.
        out_ref[...] += jnp.sum(x.reshape(-1, SUBLANE, LANE), axis=0)

    # Hot path: fully in-bounds blocks, no masking.
    @pl.when(blk_idx < num_blocks - 1)
    def _():
        _accumulate(term)

    # Tail path: last (possibly partial) block, plus any clamped duplicate
    # block slots when num_parts * steps_per_part > num_blocks.  Row-only
    # mask: lane padding is zero-filled and contributes exactly 0; only rows
    # past the array extent must be discarded (via select, never multiply).
    @pl.when(blk_idx >= num_blocks - 1)
    def _():
        row_ids = blk_idx * blk_rows + jax.lax.broadcasted_iota(
            jnp.int32, term.shape, 0)
        _accumulate(jnp.where(row_ids < rows, term, 0.0))


def od_loss(predict, truth, *, block_rows=None, num_parts=None):
    """Pallas implementation of OD_loss.forward. Returns a scalar f32 loss."""
    assert predict.shape == truth.shape, (predict.shape, truth.shape)
    total_n = int(predict.size)

    chip = _detect_chip()
    cfg_parts, per_buf_bytes, vmem_limit = _CHIP_CONFIG[chip]
    if num_parts is None:
        num_parts = cfg_parts

    flat_p = predict.reshape(-1)
    flat_t = truth.reshape(-1)

    # Rare path: only when total size is not a multiple of 128 lanes do we pad
    # (by < 128 elements).  Zero padding contributes exactly 0 to the loss
    # (p=0, t=0 -> term=0), so no in-kernel lane masking is needed.
    pad = (-total_n) % LANE
    if pad:
        flat_p = jnp.pad(flat_p, (0, pad))
        flat_t = jnp.pad(flat_t, (0, pad))

    rows = flat_p.shape[0] // LANE
    p2 = flat_p.reshape(rows, LANE)
    t2 = flat_t.reshape(rows, LANE)

    # Dtype-native sublane multiple: 8 (f32), 16 (bf16/f16), 32 (1-byte).
    min_itemsize = min(p2.dtype.itemsize, t2.dtype.itemsize)
    max_itemsize = max(p2.dtype.itemsize, t2.dtype.itemsize)
    sub_mult = max(SUBLANE, 32 // min_itemsize)

    if block_rows is None:
        block_rows = per_buf_bytes // (LANE * max_itemsize)
    block_rows = max(sub_mult, (block_rows // sub_mult) * sub_mult)

    # Block row count: big for throughput, shrunk (to a sublane multiple) for
    # small inputs so we do not allocate a huge mostly-empty block.
    blk_rows = min(block_rows, _round_up(rows, sub_mult))
    num_blocks = _cdiv(rows, blk_rows)
    num_parts = max(1, min(num_parts, num_blocks))
    steps_per_part = _cdiv(num_blocks, num_parts)

    def in_idx(prt, stp):
        # Clamp so over-provisioned block slots re-read the last valid block;
        # their contribution is zeroed by the in-kernel row mask.
        return (jnp.minimum(prt * steps_per_part + stp, num_blocks - 1), 0)

    partials = pl.pallas_call(
        functools.partial(_od_loss_kernel, rows=rows, num_blocks=num_blocks),
        out_shape=jax.ShapeDtypeStruct((num_parts, SUBLANE, LANE),
                                       jnp.float32),
        grid_spec=pltpu.PrefetchScalarGridSpec(
            num_scalar_prefetch=0,
            grid=(num_parts, steps_per_part),
            in_specs=[
                pl.BlockSpec((blk_rows, LANE), in_idx),
                pl.BlockSpec((blk_rows, LANE), in_idx),
            ],
            out_specs=pl.BlockSpec((1, SUBLANE, LANE),
                                   lambda prt, stp: (prt, 0, 0)),
        ),
        compiler_params=pltpu.CompilerParams(
            dimension_semantics=("parallel", "arbitrary"),
            vmem_limit_bytes=vmem_limit,
        ),
    )(p2, t2)

    # Tiny final reduction over num_parts * 8 * 128 partial sums.
    return jnp.sum(partials) / jnp.float32(total_n)


def od_loss_ref(predict, truth):
    """Pure-JAX reference matching the PyTorch module."""
    p = predict.astype(jnp.float32)
    t = truth.astype(jnp.float32)
    mask = t < 1.0
    mask2 = p > 0.0
    term = (p - t) ** 2 * (~mask) + (jnp.where(mask2, p, 0.0) - t) ** 2 * mask
    return jnp.mean(term)


if __name__ == "__main__":
    key = jax.random.PRNGKey(0)
    k1, k2 = jax.random.split(key)
    # Small shapes consistent with a detection-style map: (B, C, H, W)
    predict = jax.random.normal(k1, (2, 4, 16, 16), dtype=jnp.float32)
    # truth spans values below and above 1 so both mask branches are exercised
    truth = jax.random.uniform(k2, (2, 4, 16, 16), dtype=jnp.float32) * 2.0

    loss = od_loss(predict, truth)
    jax.block_until_ready(loss)

    ref = od_loss_ref(predict, truth)
    assert jnp.allclose(loss, ref, rtol=1e-5, atol=1e-6), (loss, ref)
    print("KERNEL_OK")
</pallas_src>

<mosaic_0001>
module attributes {stable_mosaic.version = 11 : i64} {
  func.func @_od_loss_kernel(%arg0: i32, %arg1: i32, %arg2: memref<16x128xf32, #tpu.memory_space<vmem>>, %arg3: memref<16x128xf32, #tpu.memory_space<vmem>>, %arg4: memref<1x8x128xf32, #tpu.memory_space<vmem>>) attributes {dimension_semantics = [#tpu.dimension_semantics<parallel>, #tpu.dimension_semantics<arbitrary>], iteration_bounds = array<i64: 1, 1>, scalar_prefetch = 0 : i64, scratch_operands = 0 : i64, tpu.core_type = #tpu.core_type<tc>, window_params = [{transform_indices = @transform_0, window_bounds = array<i64: 16, 128>}, {transform_indices = @transform_1, window_bounds = array<i64: 16, 128>}, {transform_indices = @transform_2, window_bounds = array<i64: 1, 8, 128>}]} {
    %c0_i32 = arith.constant 0 : i32
    %0 = arith.cmpi eq, %arg1, %c0_i32 : i32
    %1 = arith.extui %0 : i1 to i32
    %c0_i32_0 = arith.constant 0 : i32
    %2 = arith.cmpi ne, %1, %c0_i32_0 : i32
    scf.if %2 {
      %cst_9 = arith.constant 0.000000e+00 : f32
      %20 = vector.broadcast %cst_9 : f32 to vector<1x8x128xf32>
      %c0_10 = arith.constant 0 : index
      %c0_11 = arith.constant 0 : index
      %c0_12 = arith.constant 0 : index
      %21 = vector.load %arg4[%c0_10, %c0_11, %c0_12] : memref<1x8x128xf32, #tpu.memory_space<vmem>>, vector<1x8x128xf32>
      tpu.vector_store %arg4[%c0_10, %c0_11, %c0_12], %20 {strides = array<i32>} : memref<1x8x128xf32, #tpu.memory_space<vmem>>, vector<1x8x128xf32>,
    } else {
    }
    %c0 = arith.constant 0 : index
    %c0_1 = arith.constant 0 : index
    %3 = vector.load %arg2[%c0, %c0_1] : memref<16x128xf32, #tpu.memory_space<vmem>>, vector<16x128xf32>
    %c0_2 = arith.constant 0 : index
    %c0_3 = arith.constant 0 : index
    %4 = vector.load %arg3[%c0_2, %c0_3] : memref<16x128xf32, #tpu.memory_space<vmem>>, vector<16x128xf32>
    %cst = arith.constant 1.000000e+00 : f32
    %5 = vector.broadcast %cst : f32 to vector<16x128xf32>
    %6 = arith.cmpf olt, %4, %5 : vector<16x128xf32>
    %cst_4 = arith.constant 0.000000e+00 : f32
    %7 = vector.broadcast %cst_4 : f32 to vector<16x128xf32>
    %8 = arith.maximumf %3, %7 : vector<16x128xf32>
    %9 = arith.select %6, %8, %3 : vector<16x128xi1>, vector<16x128xf32>
    %10 = arith.subf %9, %4 : vector<16x128xf32>
    %11 = arith.mulf %10, %10 : vector<16x128xf32>
    %c1_i32 = arith.constant 1 : i32
    %12 = arith.muli %arg0, %c1_i32 : i32
    %13 = arith.addi %12, %arg1 : i32
    %c0_i32_5 = arith.constant 0 : i32
    %14 = arith.cmpi slt, %13, %c0_i32_5 : i32
    %15 = arith.extui %14 : i1 to i32
    %c0_i32_6 = arith.constant 0 : i32
    %16 = arith.cmpi ne, %15, %c0_i32_6 : i32
    scf.if %16 {
      %c0_9 = arith.constant 0 : index
      %c0_10 = arith.constant 0 : index
      %c0_11 = arith.constant 0 : index
      %20 = vector.load %arg4[%c0_9, %c0_10, %c0_11] : memref<1x8x128xf32, #tpu.memory_space<vmem>>, vector<1x8x128xf32>
      %21 = vector.shape_cast %11 : vector<16x128xf32> to vector<2x8x128xf32>
      %cst_12 = arith.constant dense<0.000000e+00> : vector<8x128xf32>
      %22 = vector.multi_reduction <add>, %21, %cst_12 [0] : vector<2x8x128xf32> to vector<8x128xf32>
      %23 = vector.shape_cast %22 : vector<8x128xf32> to vector<1x8x128xf32>
      %24 = arith.addf %20, %23 : vector<1x8x128xf32>
      %c0_13 = arith.constant 0 : index
      %c0_14 = arith.constant 0 : index
      %c0_15 = arith.constant 0 : index
      %25 = vector.load %arg4[%c0_13, %c0_14, %c0_15] : memref<1x8x128xf32, #tpu.memory_space<vmem>>, vector<1x8x128xf32>
      tpu.vector_store %arg4[%c0_13, %c0_14, %c0_15], %24 {strides = array<i32>} : memref<1x8x128xf32, #tpu.memory_space<vmem>>, vector<1x8x128xf32>,
    } else {
    }
    %c0_i32_7 = arith.constant 0 : i32
    %17 = arith.cmpi sge, %13, %c0_i32_7 : i32
    %18 = arith.extui %17 : i1 to i32
    %c0_i32_8 = arith.constant 0 : i32
    %19 = arith.cmpi ne, %18, %c0_i32_8 : i32
    scf.if %19 {
      %c16_i32 = arith.constant 16 : i32
      %20 = arith.muli %13, %c16_i32 : i32
      %21 = tpu.iota {dimensions = array<i32: 0>} : vector<16x128xi32>
      %22 = vector.broadcast %20 : i32 to vector<16x128xi32>
      %23 = arith.addi %22, %21 : vector<16x128xi32>
      %c16_i32_9 = arith.constant 16 : i32
      %24 = vector.broadcast %c16_i32_9 : i32 to vector<16x128xi32>
      %25 = arith.cmpi slt, %23, %24 : vector<16x128xi32>
      %cst_10 = arith.constant 0.000000e+00 : f32
      %26 = vector.broadcast %cst_10 : f32 to vector<16x128xf32>
      %27 = arith.select %25, %11, %26 : vector<16x128xi1>, vector<16x128xf32>
      %c0_11 = arith.constant 0 : index
      %c0_12 = arith.constant 0 : index
      %c0_13 = arith.constant 0 : index
      %28 = vector.load %arg4[%c0_11, %c0_12, %c0_13] : memref<1x8x128xf32, #tpu.memory_space<vmem>>, vector<1x8x128xf32>
      %29 = vector.shape_cast %27 : vector<16x128xf32> to vector<2x8x128xf32>
      %cst_14 = arith.constant dense<0.000000e+00> : vector<8x128xf32>
      %30 = vector.multi_reduction <add>, %29, %cst_14 [0] : vector<2x8x128xf32> to vector<8x128xf32>
      %31 = vector.shape_cast %30 : vector<8x128xf32> to vector<1x8x128xf32>
      %32 = arith.addf %28, %31 : vector<1x8x128xf32>
      %c0_15 = arith.constant 0 : index
      %c0_16 = arith.constant 0 : index
      %c0_17 = arith.constant 0 : index
      %33 = vector.load %arg4[%c0_15, %c0_16, %c0_17] : memref<1x8x128xf32, #tpu.memory_space<vmem>>, vector<1x8x128xf32>
      tpu.vector_store %arg4[%c0_15, %c0_16, %c0_17], %32 {strides = array<i32>} : memref<1x8x128xf32, #tpu.memory_space<vmem>>, vector<1x8x128xf32>,
    } else {
    }
    return
  }
  func.func @transform_0(%arg0: i32, %arg1: i32) -> (i32, i32) {
    %c1_i32 = arith.constant 1 : i32
    %0 = arith.muli %arg0, %c1_i32 : i32
    %1 = arith.addi %0, %arg1 : i32
    %c0_i32 = arith.constant 0 : i32
    %2 = arith.minsi %1, %c0_i32 : i32
    %c0_i32_0 = arith.constant 0 : i32
    %c0_i32_1 = arith.constant 0 : i32
    return %2, %c0_i32_0 : i32, i32
  }
  func.func @transform_1(%arg0: i32, %arg1: i32) -> (i32, i32) {
    %c1_i32 = arith.constant 1 : i32
    %0 = arith.muli %arg0, %c1_i32 : i32
    %1 = arith.addi %0, %arg1 : i32
    %c0_i32 = arith.constant 0 : i32
    %2 = arith.minsi %1, %c0_i32 : i32
    %c0_i32_0 = arith.constant 0 : i32
    %c0_i32_1 = arith.constant 0 : i32
    return %2, %c0_i32_0 : i32, i32
  }
  func.func @transform_2(%arg0: i32, %arg1: i32) -> (i32, i32, i32) {
    %c0_i32 = arith.constant 0 : i32
    %c0_i32_0 = arith.constant 0 : i32
    %c0_i32_1 = arith.constant 0 : i32
    return %arg0, %c0_i32, %c0_i32_0 : i32, i32, i32
  }
}

</mosaic_0001>

<bundles_post_ra>
// kernel: tpu_custom_call.1
= control target key start
LH: loop header
LB: loop body
LE: loop exit
PB: predicated region body
PF: predicated region fallthrough
CT: control target
= control target key end

     0   :  { %7 = vsyncpa [#allocation3], 0  ;;  %s261_s0 = inlined_call_operand.hbm [shape: f32[16,128], index: 0, kind: input, shape index: {}]   ;;  %s262_s1 = inlined_call_operand.hbm [shape: f32[16,128], index: 1, kind: input, shape index: {}]   ;;  %s263_s2 = inlined_call_operand.hbm [shape: f32[1,8,128], index: 2, kind: output, shape index: {}]  }
   0x1   :  { %8 = vsyncpa [#allocation6], 0 }
   0x2   :  { %9 = vsyncpa [#allocation4], 0  ;;  %s205_s9 = smov [#allocation2]   ;;  %s133_s13 = scalar_lea.hbm %s261_s0, 256 }
   0x3   :  { %s21_s10 = sshll.u32 %s205_s9, 4  ;;  %p134_p0 = scmp.ne.s32.totalorder %s261_s0, %s133_s13  ;;  %s22_s10 = int_to_ptr.vmem [resolvable:$true] %s21_s10 }
   0x4   :  { %p137_p1 = scmp.lt.u32.totalorder %s133_s13, %s261_s0 }
   0x6   :  { %p139_p2 = pnand %p137_p1, %p134_p0 }
   0x8   :  { %142 = shalt.err (!%p139_p2)
}
   0x9   :  { %s143_s18 = scalar_lea.vmem %s22_s10, 256  ;;  %p148_p4 = scmp.lt.s32.totalorder %s22_s10, %s22_s10 }
   0xa   :  { %p144_p3 = scmp.ne.s32.totalorder %s22_s10, %s143_s18  ;;  %p149_p5 = scmp.lt.s32.totalorder %s143_s18, %s143_s18 }
   0xc   :  { %p150_p6 = por %p149_p5, %p148_p4 }
   0xe   :  { %p151_p7 = pnand %p150_p6, %p144_p3 }
  0x10   :  { %154 = shalt.err (!%p151_p7)
}
  0x11   :  { %s206_s19 = smov 128   ;;  %s207_s20 = smov 8  }
  0x12   :  { %27 = dma.hbm_to_vmem [thread:$0]  %s261_s0, 256, %s22_s10, [#allocation3], %s206_s19, %s206_s19, %s207_s20  }
  0x13   :  { %s208_s23 = smov [#allocation5]   ;;  %s155_s27 = scalar_lea.hbm %s262_s1, 256 }
  0x14   :  { %s39_s24 = sshll.u32 %s208_s23, 4  ;;  %p156_p8 = scmp.ne.s32.totalorder %s262_s1, %s155_s27  ;;  %s40_s24 = int_to_ptr.vmem [resolvable:$true] %s39_s24 }
  0x15   :  { %p159_p9 = scmp.lt.u32.totalorder %s155_s27, %s262_s1 }
  0x17   :  { %p161_p10 = pnand %p159_p9, %p156_p8 }
  0x19   :  { %164 = shalt.err (!%p161_p10)
}
  0x1a   :  { %s165_s4 = scalar_lea.vmem %s40_s24, 256  ;;  %p170_p12 = scmp.lt.s32.totalorder %s40_s24, %s40_s24 }
  0x1b   :  { %p166_p11 = scmp.ne.s32.totalorder %s40_s24, %s165_s4  ;;  %p171_p13 = scmp.lt.s32.totalorder %s165_s4, %s165_s4 }
  0x1d   :  { %p172_p0 = por %p171_p13, %p170_p12 }
  0x1f   :  { %p173_p1 = pnand %p172_p0, %p166_p11 }
  0x21   :  { %176 = shalt.err (!%p173_p1)
}
  0x22   :  { %45 = dma.hbm_to_vmem [thread:$0]  %s262_s1, 256, %s40_s24, [#allocation6], %s206_s19, %s206_s19, %s207_s20  }
  0x23   :  { %199 = dma.done.wait [#allocation3], 256  }
  0x24   :  { %200 = vsyncadd [#allocation3], 4294967040 }
  0x25   :  { %201 = dma.done.wait [#allocation6], 256  }
  0x26   :  { %202 = vsyncadd [#allocation6], 4294967040  ;;  %v65_v0 = vld [vmem:[#allocation2] sm:$0xff]  ;;  %v66_v1 = vld [vmem:[#allocation2 + $0x8] sm:$0xff]  ;;  %s209_s6 = smov [#allocation7]  }
  0x27   :  { %v67_v2 = vld [vmem:[#allocation5] sm:$0xff]  ;;  %v68_v3 = vld [vmem:[#allocation5 + $0x8] sm:$0xff]  ;;  %v71_v4 = vmax.f32 %v65_v0, 0.0  ;;  %v72_v5 = vmax.f32 %v66_v1, 0.0  ;;  %s113_s1 = sshll.u32 %s209_s6, 4  ;;  %s114_s1 = int_to_ptr.vmem [resolvable:$true] %s113_s1 }
  0x28   :  { %vm69_vm0 = vcmp.lt.f32.partialorder %v67_v2, 1.0  ;;  %vm70_vm1 = vcmp.lt.f32.partialorder %v68_v3, 1.0  ;;  %s177_s7 = scalar_lea.vmem %s114_s1, 128  ;;  %p182_p3 = scmp.lt.s32.totalorder %s114_s1, %s114_s1 }
  0x29   :  { %v73_v6 = vsel %vm69_vm0, %v71_v4, %v65_v0  ;;  %v74_v7 = vsel %vm70_vm1, %v72_v5, %v66_v1  ;;  %p178_p2 = scmp.ne.s32.totalorder %s114_s1, %s177_s7  ;;  %p183_p4 = scmp.lt.s32.totalorder %s177_s7, %s177_s7 }
  0x2a   :  { %v75_v8 = vsub.f32 %v73_v6, %v67_v2  ;;  %v76_v9 = vsub.f32 %v74_v7, %v68_v3 }
  0x2b   :  { %p184_p5 = por %p183_p4, %p182_p3 }
  0x2c   :  { %v77_v10 = vmul.f32 %v75_v8, %v75_v8  ;;  %v78_v11 = vmul.f32 %v76_v9, %v76_v9 }
  0x2d   :  { %p185_p6 = pnand %p184_p5, %p178_p2 }
  0x2e   :  { %v104_v12 = vadd.f32 %v78_v11, %v77_v10 }
  0x30   :  { %106 = vst [vmem:[#allocation7] sm:$0xff] %v104_v12 }
  0x31   :  { %188 = shalt.err (!%p185_p6)
}
  0x32   :  { %s189_s10 = scalar_lea.hbm %s263_s2, 128 }
  0x33   :  { %p190_p7 = scmp.ne.s32.totalorder %s263_s2, %s189_s10  ;;  %p193_p8 = scmp.lt.u32.totalorder %s189_s10, %s263_s2 }
  0x35   :  { %p195_p9 = pnand %p193_p8, %p190_p7 }
  0x37   :  { %198 = shalt.err (!%p195_p9)
}
  0x38   :  { %116 = dma.vmem_to_hbm [thread:$0]  %s114_s1, 128, %s263_s2, [#allocation4]  }
  0x39   :  { %203 = dma.done.wait [#allocation4], 128  }
  0x3a   :  { %204 = vsyncadd [#allocation4], 4294967168 }
  0x3b   :  { %120 = vsyncpa [#allocation3], 1 }
  0x3c   :  { %121 = vsyncpa [#allocation6], 1 }
  0x3d   :  { %122 = vsyncpa [#allocation4], 1 }

</bundles_post_ra>
